<compile_context>
chip_gen: v6e
topology: v6e:2x2x1
jax: 0.10.0
libtpu: 0.0.40
codegen_flags: <defaults>
</compile_context>

<pallas_src>
import jax
import jax.numpy as jnp
from jax.experimental import pallas as pl
from jax.experimental.pallas import tpu as pltpu


_FALLBACK_BYTES = 4 * 1024 * 1024  # below this, fused XLA multiply is faster


def _drop_path_kernel(x_ref, s_ref, o_ref):
    # x_ref / o_ref: (TB, TD) VMEM tile; s_ref: (TB, 1) per-sample scale.
    # Single VPU multiply in the input dtype; HBM-bandwidth bound.
    o_ref[...] = x_ref[...] * s_ref[...]


def _round_up(x, m):
    return ((x + m - 1) // m) * m


def _vmem_budget():
    """Generation-aware (per-buffer block budget, scoped-VMEM limit)."""
    cap = None
    try:
        info = pltpu.get_tpu_info()
        cap = getattr(info, "vmem_capacity_bytes", None)
    except Exception:
        cap = None
    if cap is not None and cap >= 128 * 1024 * 1024:
        # v5e / v6e: 128 MiB VMEM -> larger streaming tiles.
        return 12 * 1024 * 1024, 64 * 1024 * 1024
    # v7x (64 MiB VMEM per TC) or unknown: 2 bufs x 2 arrays x 6 MiB ~= 24 MiB.
    return 6 * 1024 * 1024, 32 * 1024 * 1024


def _choose_tiles(B, D, itemsize, max_block_bytes):
    """Pick (TB, TD) for a lane-dense (B, D) streaming multiply."""
    # Native sublane packing: 8 rows f32, 16 bf16, 32 int8/fp8.
    sublane = max(8, 32 // max(1, itemsize))
    if D * itemsize * sublane <= max_block_bytes:
        # Whole feature axis fits even at a minimal batch tile: take TD = D
        # (full-dim exception) and grow TB toward the byte budget.
        TD = D
        tb_budget = max_block_bytes // max(1, D * itemsize)
        tb_budget = max(sublane, (tb_budget // sublane) * sublane)
        TB = B if B <= tb_budget else tb_budget
    else:
        # Feature axis too large for one block: minimal packed batch tile,
        # lane-dense feature tile (multiple of 128).
        TB = B if B < sublane else sublane
        TD = max(128, (max_block_bytes // (TB * itemsize) // 128) * 128)
    return TB, TD, sublane


def drop_path(x, drop_prob: float = 0.0, training: bool = False, *,
              key=None, seed: int = 0, force_pallas: bool = False):
    """Pallas equivalent of torch drop_path (stochastic depth, per-sample)."""
    if drop_prob == 0.0 or not training:
        return x
    keep_prob = 1.0 - drop_prob

    B = x.shape[0]
    D = 1
    for d in x.shape[1:]:
        D *= d
    x2 = x.reshape(B, D)  # lane-dense (B, C*H*W)

    # Per-sample scale (0 or 1/keep_prob), matching torch:
    #   floor(keep_prob + U[0,1)) applied to x / keep_prob.
    # Thread a fresh key per training step for correct stochastic-depth stats.
    if key is None:
        key = jax.random.PRNGKey(seed)
    u = jax.random.uniform(key, (B, 1), dtype=jnp.float32)
    mask = jnp.floor(jnp.float32(keep_prob) + u)
    # Kept in the input dtype: one VPU multiply, no f32 tile round-trip.
    # (For bf16/fp8 inputs 1/keep_prob is quantized to the input dtype.)
    scale = (mask * (1.0 / jnp.float32(keep_prob))).astype(x.dtype)  # (B, 1)

    itemsize = jnp.dtype(x.dtype).itemsize
    total_bytes = B * D * itemsize

    # Tiny tensors: pallas_call launch + pipeline warmup dominates -> fuse in XLA.
    if total_bytes < _FALLBACK_BYTES and not force_pallas:
        return (x2 * scale).reshape(x.shape)

    max_block_bytes, vmem_limit = _vmem_budget()
    TB, TD, sublane = _choose_tiles(B, D, itemsize, max_block_bytes)

    # v7x has 2 TensorCores: keep >= 2 steps along a parallel axis for
    # mid-size inputs so Mosaic can shard the streaming loop across both TCs.
    if (total_bytes >= _FALLBACK_BYTES
            and pl.cdiv(B, TB) == 1 and pl.cdiv(D, TD) == 1):
        if D >= 256:
            TD = _round_up(pl.cdiv(D, 2), 128)
        elif B >= 2 * sublane:
            TB = _round_up(pl.cdiv(B, 2), sublane)

    # D axis innermost: the (TB, 1) scale block index (i, 0) is constant across
    # the inner loop, so its DMA is not re-issued per step. Do not reorder.
    grid = (pl.cdiv(B, TB), pl.cdiv(D, TD))

    cost = pl.CostEstimate(
        flops=B * D,
        transcendentals=0,
        bytes_accessed=2 * B * D * itemsize,
    )

    out = pl.pallas_call(
        _drop_path_kernel,
        out_shape=jax.ShapeDtypeStruct((B, D), x.dtype),
        grid=grid,
        in_specs=[
            pl.BlockSpec((TB, TD), lambda i, j: (i, j)),   # x tile
            pl.BlockSpec((TB, 1), lambda i, j: (i, 0)),    # per-sample scale
        ],
        out_specs=pl.BlockSpec((TB, TD), lambda i, j: (i, j)),
        compiler_params=pltpu.CompilerParams(
            dimension_semantics=("parallel", "parallel"),  # megacore-friendly
            vmem_limit_bytes=vmem_limit,
        ),
        cost_estimate=cost,
    )(x2, scale)

    return out.reshape(x.shape)


class DropPath:
    """Drop paths (Stochastic Depth) per sample."""

    def __init__(self, drop_prob=None):
        self.drop_prob = drop_prob
        self.training = True

    def __call__(self, x, *, key=None, seed: int = 0, force_pallas: bool = False):
        return drop_path(x, self.drop_prob if self.drop_prob else 0.0,
                         self.training, key=key, seed=seed,
                         force_pallas=force_pallas)


if __name__ == "__main__":
    key = jax.random.PRNGKey(0)
    x = jax.random.normal(key, (2, 4, 16, 16), dtype=jnp.float32)  # NCHW

    module = DropPath(drop_prob=0.2)

    # training=True path: force the Pallas kernel (small shape would otherwise
    # take the XLA-fusion fallback).
    module.training = True
    y_train = module(x, seed=123, force_pallas=True)
    y_train = jax.block_until_ready(y_train)

    # Fallback (fused XLA) path must match the kernel path exactly.
    y_fallback = module(x, seed=123, force_pallas=False)
    y_fallback = jax.block_until_ready(y_fallback)
    assert jnp.allclose(y_train, y_fallback), "kernel vs fallback mismatch"

    # eval path (identity)
    module.training = False
    y_eval = module(x)
    y_eval = jax.block_until_ready(y_eval)
    assert jnp.allclose(y_eval, x), "eval path must be identity"

    # Per-sample semantics: each sample is either zeroed or scaled by 1/keep_prob.
    keep_prob = 1.0 - 0.2
    for b in range(x.shape[0]):
        out_b = y_train[b]
        is_zero = bool(jnp.allclose(out_b, 0.0))
        is_scaled = bool(jnp.allclose(out_b, x[b] / keep_prob, rtol=1e-5, atol=1e-5))
        assert is_zero or is_scaled, f"sample {b} violates drop_path semantics"

    print("KERNEL_OK")
</pallas_src>

<mosaic_0001>
module attributes {stable_mosaic.version = 11 : i64} {
  func.func @_drop_path_kernel(%arg0: i32, %arg1: i32, %arg2: memref<2x1024xf32, #tpu.memory_space<vmem>>, %arg3: memref<2x1xf32, #tpu.memory_space<vmem>>, %arg4: memref<2x1024xf32, #tpu.memory_space<vmem>>) attributes {dimension_semantics = [#tpu.dimension_semantics<parallel>, #tpu.dimension_semantics<parallel>], iteration_bounds = array<i64: 1, 1>, scalar_prefetch = 0 : i64, scratch_operands = 0 : i64, tpu.core_type = #tpu.core_type<tc>, window_params = [{transform_indices = @transform_0, window_bounds = array<i64: 2, 1024>}, {transform_indices = @transform_1, window_bounds = array<i64: 2, 1>}, {transform_indices = @transform_2, window_bounds = array<i64: 2, 1024>}]} {
    %c0 = arith.constant 0 : index
    %c0_0 = arith.constant 0 : index
    %0 = vector.load %arg2[%c0, %c0_0] : memref<2x1024xf32, #tpu.memory_space<vmem>>, vector<2x1024xf32>
    %c0_1 = arith.constant 0 : index
    %c0_2 = arith.constant 0 : index
    %1 = vector.load %arg3[%c0_1, %c0_2] : memref<2x1xf32, #tpu.memory_space<vmem>>, vector<2x1xf32>
    %2 = vector.broadcast %1 : vector<2x1xf32> to vector<2x1024xf32>
    %3 = arith.mulf %0, %2 : vector<2x1024xf32>
    %c0_3 = arith.constant 0 : index
    %c0_4 = arith.constant 0 : index
    %4 = vector.load %arg4[%c0_3, %c0_4] : memref<2x1024xf32, #tpu.memory_space<vmem>>, vector<2x1024xf32>
    tpu.vector_store %arg4[%c0_3, %c0_4], %3 {strides = array<i32>} : memref<2x1024xf32, #tpu.memory_space<vmem>>, vector<2x1024xf32>,
    return
  }
  func.func @transform_0(%arg0: i32, %arg1: i32) -> (i32, i32) {
    %c0_i32 = arith.constant 0 : i32
    return %arg0, %arg1 : i32, i32
  }
  func.func @transform_1(%arg0: i32, %arg1: i32) -> (i32, i32) {
    %c0_i32 = arith.constant 0 : i32
    %c0_i32_0 = arith.constant 0 : i32
    return %arg0, %c0_i32 : i32, i32
  }
  func.func @transform_2(%arg0: i32, %arg1: i32) -> (i32, i32) {
    %c0_i32 = arith.constant 0 : i32
    return %arg0, %arg1 : i32, i32
  }
}

</mosaic_0001>

<bundles_post_ra>
// kernel: tpu_custom_call.1
= control target key start
LH: loop header
LB: loop body
LE: loop exit
PB: predicated region body
PF: predicated region fallthrough
CT: control target
= control target key end

     0   :  { %7 = vsyncpa [#allocation3], 0  ;;  %s135_s0 = inlined_call_operand.hbm [shape: f32[2,1024], index: 0, kind: input, shape index: {}]   ;;  %s136_s1 = inlined_call_operand.vmem [shape: f32[2,1], index: 1, kind: input, shape index: {}]   ;;  %s137_s2 = inlined_call_operand.hbm [shape: f32[2,1024], index: 2, kind: output, shape index: {}]  }
   0x1   :  { %8 = vsyncpa [#allocation4], 0  ;;  %s107_s9 = smov [#allocation2]  }
   0x2   :  { %s15_s10 = sshll.u32 %s107_s9, 4  ;;  %s16_s10 = int_to_ptr.vmem [resolvable:$true] %s15_s10 }
   0x3   :  { %s71_s11 = scalar_lea.vmem %s16_s10, 256  ;;  %p76_p1 = scmp.lt.s32.totalorder %s16_s10, %s16_s10 }
   0x4   :  { %p72_p0 = scmp.ne.s32.totalorder %s16_s10, %s71_s11  ;;  %p77_p2 = scmp.lt.s32.totalorder %s71_s11, %s71_s11 }
   0x6   :  { %p78_p3 = por %p77_p2, %p76_p1 }
   0x8   :  { %p79_p4 = pnand %p78_p3, %p72_p0 }
   0xa   :  { %82 = shalt.err (!%p79_p4)
}
   0xb   :  { %18 = dma.hbm_to_vmem [thread:$0]  %s135_s0, 256, %s16_s10, [#allocation3]  }
   0xc   :  { %103 = dma.done.wait [#allocation3], 256  }
   0xd   :  { %104 = vsyncadd [#allocation3], 4294967040  ;;  %v108_v0 = vmov 0   ;;  %v26_v1 = vld [vmem:[%s136_s1] sm:$0x3]  ;;  %v34_v4 = vlaneseq  ;;  %v25_v10 = vld [vmem:[#allocation2 + $0x8] sm:$0xff] }
   0xe   :  { %62 = vset.pattern.permute.xlu0 %v108_v0  ;;  %v109_v2 = vmov 269488144   ;;  %v24_v9 = vld [vmem:[#allocation2] sm:$0xff]  ;;  %s110_s16 = smov [#allocation5]  }
   0xf   :  { %29 = vperm.xlu0 %62, %v26_v1   ;;  %v32_v3 = vunpack.c.l.s4 %v109_v2  ;;  %v35_v6 = vshrl.u32 %v34_v4, 7  ;;  %s49_s0 = sshll.u32 %s110_s16, 4  ;;  %s50_s0 = int_to_ptr.vmem [resolvable:$true] %s49_s0 }
  0x10   :  { %s83_s17 = scalar_lea.vmem %s50_s0, 256  ;;  %p88_p6 = scmp.lt.s32.totalorder %s50_s0, %s50_s0 }
  0x11   :  { %v33_v5 = vunpack.c.0.s8 %v32_v3  ;;  %p84_p5 = scmp.ne.s32.totalorder %s50_s0, %s83_s17  ;;  %p89_p7 = scmp.lt.s32.totalorder %s83_s17, %s83_s17 }
  0x13   :  { %v36_v7 = vsub.s32 %v33_v5, %v35_v6  ;;  %p90_p8 = por %p89_p7, %p88_p6 }
  0x15   :  { %p91_p9 = pnand %p90_p8, %p84_p5 }
  0x8a   :  { %v30_v8 = vpop.permute.xlu0 %29 }
  0x8b   :  { %v37_v11 = vrot.slane %v30_v8, %v36_v7 }
  0x8d   :  { %v39_v12 = vmul.f32 %v37_v11, %v24_v9  ;;  %v40_v13 = vmul.f32 %v37_v11, %v25_v10 }
  0x8f   :  { %41 = vst [vmem:[#allocation5] sm:$0xff] %v39_v12  ;;  %42 = vst [vmem:[#allocation5 + $0x8] sm:$0xff] %v40_v13 }
  0x90   :  { %94 = shalt.err (!%p91_p9)
}
  0x91   :  { %52 = dma.vmem_to_hbm [thread:$0]  %s50_s0, 256, %s137_s2, [#allocation4]  }
  0x92   :  { %105 = dma.done.wait [#allocation4], 256  }
  0x93   :  { %106 = vsyncadd [#allocation4], 4294967040 }
  0x94   :  { %56 = vsyncpa [#allocation3], 1 }
  0x95   :  { %57 = vsyncpa [#allocation4], 1 }

</bundles_post_ra>
